<compile_context>
chip_gen: v7x
topology: tpu7x:2x2x1
jax: 0.10.0
libtpu: 0.0.40
codegen_flags: <defaults>
</compile_context>

<pallas_src>
import jax
import jax.numpy as jnp
from jax.experimental import pallas as pl
from jax.experimental.pallas import tpu as pltpu

LANE = 128          # TPU lane width: pad feature dims to this for dense stores
BN_EPS = 1e-5       # nn.BatchNorm1d default eps
GIN_EPS = 0.0       # GINConv default eps (train_eps=False)


def _round_up(v, m):
    return (v + m - 1) // m * m


def _pad_to(x, rows, cols):
    r, c = x.shape
    return jnp.pad(x, ((0, rows - r), (0, cols - c)))


# --------------------------------------------------------------------------
# Kernel 1: one fused GIN layer
#   h  = A_hat @ x                      (neighbor sum + (1+eps)*self)
#   h1 = relu(h @ W1 + b1)              (MLP layer 1)
#   h2 = h1 @ W2 + b2                   (MLP layer 2)
#   z  = relu(h2)                       (outer F.relu in GConv.forward)
#   o  = BatchNorm1d(z)                 (training-mode batch stats, fused)
# All weights arrive pre-transposed to (in, out) and zero-padded to 128 lanes.
# --------------------------------------------------------------------------
def _gin_layer_kernel(a_ref, x_ref, w1_ref, b1_ref, w2_ref, b2_ref,
                      gamma_ref, beta_ref, o_ref):
    h = jnp.dot(a_ref[...], x_ref[...], preferred_element_type=jnp.float32)
    h1 = jnp.dot(h, w1_ref[...], preferred_element_type=jnp.float32) + b1_ref[...]
    h1 = jnp.maximum(h1, 0.0)
    h2 = jnp.dot(h1, w2_ref[...], preferred_element_type=jnp.float32) + b2_ref[...]
    z = jnp.maximum(h2, 0.0)

    # BatchNorm1d over the node axis (training-mode, biased variance).
    n = z.shape[0]
    mean = jnp.sum(z, axis=0, keepdims=True) / n
    centered = z - mean
    var = jnp.sum(centered * centered, axis=0, keepdims=True) / n
    inv_std = jax.lax.rsqrt(var + BN_EPS)          # EUP slot — essentially free
    o_ref[...] = (centered * inv_std * gamma_ref[...] + beta_ref[...]
                  ).astype(o_ref.dtype)


def gin_layer_pallas(a_hat, x_pad, w1, b1, w2, b2, gamma, beta):
    n = a_hat.shape[0]
    f = x_pad.shape[1]
    h = w1.shape[1]
    flops = 2 * n * n * f + 2 * n * f * h + 2 * n * h * h
    bytes_accessed = 4 * (n * n + n * f + f * h + h * h + 4 * h + n * h)
    return pl.pallas_call(
        _gin_layer_kernel,
        out_shape=jax.ShapeDtypeStruct((n, h), jnp.float32),
        grid=(1,),
        in_specs=[
            pl.BlockSpec((n, n), lambda i: (0, 0)),   # A_hat
            pl.BlockSpec((n, f), lambda i: (0, 0)),   # x (padded)
            pl.BlockSpec((f, h), lambda i: (0, 0)),   # W1 (in,out), padded
            pl.BlockSpec((1, h), lambda i: (0, 0)),   # b1
            pl.BlockSpec((h, h), lambda i: (0, 0)),   # W2 (in,out), padded
            pl.BlockSpec((1, h), lambda i: (0, 0)),   # b2
            pl.BlockSpec((1, h), lambda i: (0, 0)),   # BN gamma
            pl.BlockSpec((1, h), lambda i: (0, 0)),   # BN beta
        ],
        out_specs=pl.BlockSpec((n, h), lambda i: (0, 0)),
        compiler_params=pltpu.CompilerParams(
            dimension_semantics=("arbitrary",)),
        cost_estimate=pl.CostEstimate(
            flops=flops, transcendentals=h, bytes_accessed=bytes_accessed),
    )(a_hat, x_pad, w1, b1, w2, b2, gamma, beta)


# --------------------------------------------------------------------------
# Kernel 2: global_add_pool over the concatenated layer outputs
#   g = pool_mat @ z_cat   (pool_mat[g, n] = 1 if node n belongs to graph g)
# --------------------------------------------------------------------------
def _pool_kernel(p_ref, z_ref, o_ref):
    o_ref[...] = jnp.dot(p_ref[...], z_ref[...],
                         preferred_element_type=jnp.float32).astype(o_ref.dtype)


def global_add_pool_pallas(pool_pad, z_cat_pad):
    gr, n = pool_pad.shape
    c = z_cat_pad.shape[1]
    return pl.pallas_call(
        _pool_kernel,
        out_shape=jax.ShapeDtypeStruct((gr, c), jnp.float32),
        grid=(1,),
        in_specs=[
            pl.BlockSpec((gr, n), lambda i: (0, 0)),
            pl.BlockSpec((n, c), lambda i: (0, 0)),
        ],
        out_specs=pl.BlockSpec((gr, c), lambda i: (0, 0)),
        compiler_params=pltpu.CompilerParams(
            dimension_semantics=("arbitrary",)),
        cost_estimate=pl.CostEstimate(
            flops=2 * gr * n * c, transcendentals=0,
            bytes_accessed=4 * (gr * n + n * c + gr * c)),
    )(pool_pad, z_cat_pad)


# --------------------------------------------------------------------------
# Parameter prep: transpose + zero-pad ONCE (outside the per-call hot path).
# --------------------------------------------------------------------------
def prepare_padded_params(params):
    padded = []
    for (w1, b1, w2, b2, gamma, beta) in params:     # PyTorch (out, in) layout
        h_dim, in_dim = w1.shape
        f_pad = _round_up(in_dim, LANE)
        h_pad = _round_up(h_dim, LANE)
        padded.append((
            _pad_to(w1.T, f_pad, h_pad),             # (in, out), padded
            _pad_to(b1.reshape(1, -1), 1, h_pad),
            _pad_to(w2.T, h_pad, h_pad),
            _pad_to(b2.reshape(1, -1), 1, h_pad),
            _pad_to(gamma.reshape(1, -1), 1, h_pad),
            _pad_to(beta.reshape(1, -1), 1, h_pad),
        ))
    return padded


# --------------------------------------------------------------------------
# GConv.forward:  returns (z, g) = (cat(per-layer node feats), cat(pooled))
# --------------------------------------------------------------------------
def gconv_forward_pallas(x, a_hat, pool_mat, padded_params, hidden_dim):
    num_nodes = x.shape[0]
    num_graphs = pool_mat.shape[0]
    num_layers = len(padded_params)
    f0_pad = padded_params[0][0].shape[0]
    h_pad = padded_params[0][0].shape[1]

    z_pad = _pad_to(x, num_nodes, f0_pad)
    zs_pad = []
    for (w1, b1, w2, b2, gamma, beta) in padded_params:
        z_pad = gin_layer_pallas(a_hat, z_pad, w1, b1, w2, b2, gamma, beta)
        zs_pad.append(z_pad)

    # global_add_pool of the concatenation == concatenation of per-layer pools
    z_cat_pad = jnp.concatenate(zs_pad, axis=1)                  # (N, L*h_pad)
    g_rows = _round_up(num_graphs, 8)
    pool_pad = _pad_to(pool_mat, g_rows, num_nodes)
    g_pad = global_add_pool_pallas(pool_pad, z_cat_pad)          # (g_rows, L*h_pad)

    z = jnp.concatenate([zp[:, :hidden_dim] for zp in zs_pad], axis=1)
    g = jnp.concatenate(
        [g_pad[:num_graphs, l * h_pad:l * h_pad + hidden_dim]
         for l in range(num_layers)], axis=1)
    return z, g


# --------------------------------------------------------------------------
# Pure-JAX reference (unpadded) of the same forward semantics.
# --------------------------------------------------------------------------
def gconv_reference(x, a_hat, pool_mat, params):
    zs = []
    z = x
    for (w1, b1, w2, b2, gamma, beta) in params:
        h = a_hat @ z
        h1 = jnp.maximum(h @ w1.T + b1, 0.0)
        h2 = h1 @ w2.T + b2
        z = jnp.maximum(h2, 0.0)
        mean = jnp.mean(z, axis=0, keepdims=True)
        var = jnp.mean((z - mean) ** 2, axis=0, keepdims=True)
        z = (z - mean) * jax.lax.rsqrt(var + BN_EPS) * gamma + beta
        zs.append(z)
    z_cat = jnp.concatenate(zs, axis=1)
    g = pool_mat @ z_cat
    return z_cat, g


def _xavier_uniform(key, out_features, in_features, dtype=jnp.float32):
    a = (6.0 / (in_features + out_features)) ** 0.5
    return jax.random.uniform(key, (out_features, in_features), dtype,
                              minval=-a, maxval=a)


if __name__ == "__main__":
    input_dim, hidden_dim, num_layers = 32, 32, 2
    nodes_per_graph, num_graphs = 8, 2
    num_nodes = nodes_per_graph * num_graphs            # 16

    key = jax.random.PRNGKey(0)
    key, kx = jax.random.split(key)
    x = jax.random.normal(kx, (num_nodes, input_dim), jnp.float32)

    # Deterministic bidirectional ring inside each graph component.
    edges = []
    for gidx in range(num_graphs):
        off = gidx * nodes_per_graph
        for i in range(nodes_per_graph):
            j = (i + 1) % nodes_per_graph
            edges.append((off + i, off + j))
            edges.append((off + j, off + i))
    edge_index = jnp.asarray(edges, dtype=jnp.int32).T          # (2, E)
    batch = jnp.repeat(jnp.arange(num_graphs, dtype=jnp.int32), nodes_per_graph)

    # Per-layer parameters (PyTorch layout), deterministic.
    params = []
    for l in range(num_layers):
        in_dim = input_dim if l == 0 else hidden_dim
        key, k1, k2, kb1, kb2 = jax.random.split(key, 5)
        w1 = _xavier_uniform(k1, hidden_dim, in_dim)
        w2 = _xavier_uniform(k2, hidden_dim, hidden_dim)
        bound1 = 1.0 / float(in_dim) ** 0.5
        bound2 = 1.0 / float(hidden_dim) ** 0.5
        b1 = jax.random.uniform(kb1, (hidden_dim,), jnp.float32, -bound1, bound1)
        b2 = jax.random.uniform(kb2, (hidden_dim,), jnp.float32, -bound2, bound2)
        gamma = jnp.ones((hidden_dim,), jnp.float32)
        beta = jnp.zeros((hidden_dim,), jnp.float32)
        params.append((w1, b1, w2, b2, gamma, beta))

    # Graph structure as dense operators (MXU-friendly): scatter done once in JAX.
    src, dst = edge_index[0], edge_index[1]
    adj = jnp.zeros((num_nodes, num_nodes), jnp.float32).at[dst, src].add(1.0)
    a_hat = adj + (1.0 + GIN_EPS) * jnp.eye(num_nodes, dtype=jnp.float32)
    pool_mat = jax.nn.one_hot(batch, num_graphs, dtype=jnp.float32).T  # (G, N)

    padded_params = prepare_padded_params(params)

    z, g = gconv_forward_pallas(x, a_hat, pool_mat, padded_params, hidden_dim)
    jax.block_until_ready((z, g))

    z_ref, g_ref = gconv_reference(x, a_hat, pool_mat, params)

    assert z.shape == (num_nodes, hidden_dim * num_layers)
    assert g.shape == (num_graphs, hidden_dim * num_layers)
    assert jnp.allclose(z, z_ref, atol=1e-3, rtol=1e-3)
    assert jnp.allclose(g, g_ref, atol=1e-3, rtol=1e-3)

    print("KERNEL_OK")
</pallas_src>

<mosaic_0001>
module attributes {stable_mosaic.version = 11 : i64} {
  func.func @_gin_layer_kernel(%arg0: i32, %arg1: memref<16x16xf32, #tpu.memory_space<vmem>>, %arg2: memref<16x128xf32, #tpu.memory_space<vmem>>, %arg3: memref<128x128xf32, #tpu.memory_space<vmem>>, %arg4: memref<1x128xf32, #tpu.memory_space<vmem>>, %arg5: memref<128x128xf32, #tpu.memory_space<vmem>>, %arg6: memref<1x128xf32, #tpu.memory_space<vmem>>, %arg7: memref<1x128xf32, #tpu.memory_space<vmem>>, %arg8: memref<1x128xf32, #tpu.memory_space<vmem>>, %arg9: memref<16x128xf32, #tpu.memory_space<vmem>>) attributes {dimension_semantics = [#tpu.dimension_semantics<arbitrary>], iteration_bounds = array<i64: 1>, scalar_prefetch = 0 : i64, scratch_operands = 0 : i64, tpu.core_type = #tpu.core_type<tc>, window_params = [{pipeline_mode = #tpu.pipeline_mode<synchronous>, transform_indices = @transform_0, window_bounds = array<i64: 16, 16>}, {pipeline_mode = #tpu.pipeline_mode<synchronous>, transform_indices = @transform_1, window_bounds = array<i64: 16, 128>}, {pipeline_mode = #tpu.pipeline_mode<synchronous>, transform_indices = @transform_2, window_bounds = array<i64: 128, 128>}, {pipeline_mode = #tpu.pipeline_mode<synchronous>, transform_indices = @transform_3, window_bounds = array<i64: 1, 128>}, {pipeline_mode = #tpu.pipeline_mode<synchronous>, transform_indices = @transform_4, window_bounds = array<i64: 128, 128>}, {pipeline_mode = #tpu.pipeline_mode<synchronous>, transform_indices = @transform_5, window_bounds = array<i64: 1, 128>}, {pipeline_mode = #tpu.pipeline_mode<synchronous>, transform_indices = @transform_6, window_bounds = array<i64: 1, 128>}, {pipeline_mode = #tpu.pipeline_mode<synchronous>, transform_indices = @transform_7, window_bounds = array<i64: 1, 128>}, {pipeline_mode = #tpu.pipeline_mode<synchronous>, transform_indices = @transform_8, window_bounds = array<i64: 16, 128>}]} {
    %c0 = arith.constant 0 : index
    %c0_0 = arith.constant 0 : index
    %0 = vector.load %arg1[%c0, %c0_0] : memref<16x16xf32, #tpu.memory_space<vmem>>, vector<16x16xf32>
    %c0_1 = arith.constant 0 : index
    %c0_2 = arith.constant 0 : index
    %1 = vector.load %arg2[%c0_1, %c0_2] : memref<16x128xf32, #tpu.memory_space<vmem>>, vector<16x128xf32>
    %cst = arith.constant dense<0.000000e+00> : vector<16x128xf32>
    %2 = tpu.matmul %0, %1, %cst {dimension_numbers = #tpu.dot_dimension_numbers<[1], [0], [0], [1], [0, 0, 1, 1], [], []>} : vector<16x16xf32>, vector<16x128xf32>, vector<16x128xf32> -> vector<16x128xf32>
    %c0_3 = arith.constant 0 : index
    %c0_4 = arith.constant 0 : index
    %3 = vector.load %arg3[%c0_3, %c0_4] : memref<128x128xf32, #tpu.memory_space<vmem>>, vector<128x128xf32>
    %cst_5 = arith.constant dense<0.000000e+00> : vector<16x128xf32>
    %4 = tpu.matmul %2, %3, %cst_5 {dimension_numbers = #tpu.dot_dimension_numbers<[1], [0], [0], [1], [0, 0, 1, 1], [], []>} : vector<16x128xf32>, vector<128x128xf32>, vector<16x128xf32> -> vector<16x128xf32>
    %c0_6 = arith.constant 0 : index
    %c0_7 = arith.constant 0 : index
    %5 = vector.load %arg4[%c0_6, %c0_7] : memref<1x128xf32, #tpu.memory_space<vmem>>, vector<1x128xf32>
    %6 = vector.broadcast %5 : vector<1x128xf32> to vector<16x128xf32>
    %7 = arith.addf %4, %6 : vector<16x128xf32>
    %cst_8 = arith.constant 0.000000e+00 : f32
    %8 = vector.broadcast %cst_8 : f32 to vector<16x128xf32>
    %9 = arith.maximumf %7, %8 : vector<16x128xf32>
    %c0_9 = arith.constant 0 : index
    %c0_10 = arith.constant 0 : index
    %10 = vector.load %arg5[%c0_9, %c0_10] : memref<128x128xf32, #tpu.memory_space<vmem>>, vector<128x128xf32>
    %cst_11 = arith.constant dense<0.000000e+00> : vector<16x128xf32>
    %11 = tpu.matmul %9, %10, %cst_11 {dimension_numbers = #tpu.dot_dimension_numbers<[1], [0], [0], [1], [0, 0, 1, 1], [], []>} : vector<16x128xf32>, vector<128x128xf32>, vector<16x128xf32> -> vector<16x128xf32>
    %c0_12 = arith.constant 0 : index
    %c0_13 = arith.constant 0 : index
    %12 = vector.load %arg6[%c0_12, %c0_13] : memref<1x128xf32, #tpu.memory_space<vmem>>, vector<1x128xf32>
    %13 = vector.broadcast %12 : vector<1x128xf32> to vector<16x128xf32>
    %14 = arith.addf %11, %13 : vector<16x128xf32>
    %cst_14 = arith.constant 0.000000e+00 : f32
    %15 = vector.broadcast %cst_14 : f32 to vector<16x128xf32>
    %16 = arith.maximumf %14, %15 : vector<16x128xf32>
    %cst_15 = arith.constant dense<0.000000e+00> : vector<128xf32>
    %17 = vector.multi_reduction <add>, %16, %cst_15 [0] : vector<16x128xf32> to vector<128xf32>
    %18 = vector.shape_cast %17 : vector<128xf32> to vector<1x128xf32>
    %cst_16 = arith.constant 1.600000e+01 : f32
    %19 = vector.broadcast %cst_16 : f32 to vector<1x128xf32>
    %20 = arith.divf %18, %19 : vector<1x128xf32>
    %21 = vector.broadcast %20 : vector<1x128xf32> to vector<16x128xf32>
    %22 = arith.subf %16, %21 : vector<16x128xf32>
    %23 = arith.mulf %22, %22 : vector<16x128xf32>
    %cst_17 = arith.constant dense<0.000000e+00> : vector<128xf32>
    %24 = vector.multi_reduction <add>, %23, %cst_17 [0] : vector<16x128xf32> to vector<128xf32>
    %25 = vector.shape_cast %24 : vector<128xf32> to vector<1x128xf32>
    %cst_18 = arith.constant 1.600000e+01 : f32
    %26 = vector.broadcast %cst_18 : f32 to vector<1x128xf32>
    %27 = arith.divf %25, %26 : vector<1x128xf32>
    %cst_19 = arith.constant 9.99999974E-6 : f32
    %28 = vector.broadcast %cst_19 : f32 to vector<1x128xf32>
    %29 = arith.addf %27, %28 : vector<1x128xf32>
    %30 = math.rsqrt %29 : vector<1x128xf32>
    %31 = vector.broadcast %30 : vector<1x128xf32> to vector<16x128xf32>
    %32 = arith.mulf %22, %31 : vector<16x128xf32>
    %c0_20 = arith.constant 0 : index
    %c0_21 = arith.constant 0 : index
    %33 = vector.load %arg7[%c0_20, %c0_21] : memref<1x128xf32, #tpu.memory_space<vmem>>, vector<1x128xf32>
    %34 = vector.broadcast %33 : vector<1x128xf32> to vector<16x128xf32>
    %35 = arith.mulf %32, %34 : vector<16x128xf32>
    %c0_22 = arith.constant 0 : index
    %c0_23 = arith.constant 0 : index
    %36 = vector.load %arg8[%c0_22, %c0_23] : memref<1x128xf32, #tpu.memory_space<vmem>>, vector<1x128xf32>
    %37 = vector.broadcast %36 : vector<1x128xf32> to vector<16x128xf32>
    %38 = arith.addf %35, %37 : vector<16x128xf32>
    %c0_24 = arith.constant 0 : index
    %c0_25 = arith.constant 0 : index
    %39 = vector.load %arg9[%c0_24, %c0_25] : memref<16x128xf32, #tpu.memory_space<vmem>>, vector<16x128xf32>
    tpu.vector_store %arg9[%c0_24, %c0_25], %38 {strides = array<i32>} : memref<16x128xf32, #tpu.memory_space<vmem>>, vector<16x128xf32>,
    return
  }
  func.func @transform_0(%arg0: i32) -> (i32, i32) {
    %c0_i32 = arith.constant 0 : i32
    %c0_i32_0 = arith.constant 0 : i32
    %c0_i32_1 = arith.constant 0 : i32
    return %c0_i32, %c0_i32_0 : i32, i32
  }
  func.func @transform_1(%arg0: i32) -> (i32, i32) {
    %c0_i32 = arith.constant 0 : i32
    %c0_i32_0 = arith.constant 0 : i32
    %c0_i32_1 = arith.constant 0 : i32
    return %c0_i32, %c0_i32_0 : i32, i32
  }
  func.func @transform_2(%arg0: i32) -> (i32, i32) {
    %c0_i32 = arith.constant 0 : i32
    %c0_i32_0 = arith.constant 0 : i32
    %c0_i32_1 = arith.constant 0 : i32
    return %c0_i32, %c0_i32_0 : i32, i32
  }
  func.func @transform_3(%arg0: i32) -> (i32, i32) {
    %c0_i32 = arith.constant 0 : i32
    %c0_i32_0 = arith.constant 0 : i32
    %c0_i32_1 = arith.constant 0 : i32
    return %c0_i32, %c0_i32_0 : i32, i32
  }
  func.func @transform_4(%arg0: i32) -> (i32, i32) {
    %c0_i32 = arith.constant 0 : i32
    %c0_i32_0 = arith.constant 0 : i32
    %c0_i32_1 = arith.constant 0 : i32
    return %c0_i32, %c0_i32_0 : i32, i32
  }
  func.func @transform_5(%arg0: i32) -> (i32, i32) {
    %c0_i32 = arith.constant 0 : i32
    %c0_i32_0 = arith.constant 0 : i32
    %c0_i32_1 = arith.constant 0 : i32
    return %c0_i32, %c0_i32_0 : i32, i32
  }
  func.func @transform_6(%arg0: i32) -> (i32, i32) {
    %c0_i32 = arith.constant 0 : i32
    %c0_i32_0 = arith.constant 0 : i32
    %c0_i32_1 = arith.constant 0 : i32
    return %c0_i32, %c0_i32_0 : i32, i32
  }
  func.func @transform_7(%arg0: i32) -> (i32, i32) {
    %c0_i32 = arith.constant 0 : i32
    %c0_i32_0 = arith.constant 0 : i32
    %c0_i32_1 = arith.constant 0 : i32
    return %c0_i32, %c0_i32_0 : i32, i32
  }
  func.func @transform_8(%arg0: i32) -> (i32, i32) {
    %c0_i32 = arith.constant 0 : i32
    %c0_i32_0 = arith.constant 0 : i32
    %c0_i32_1 = arith.constant 0 : i32
    return %c0_i32, %c0_i32_0 : i32, i32
  }
}

</mosaic_0001>

<bundles_post_ra>
// kernel: tpu_custom_call.1
= control target key start
LH: loop header
LB: loop body
LE: loop exit
PB: predicated region body
PF: predicated region fallthrough
CT: control target
= control target key end

     0   :  { %13 = vsyncpa [#allocation3], 0  ;;  %s908_s0 = inlined_call_operand.hbm [shape: f32[16,16], index: 0, kind: input, shape index: {}]   ;;  %s909_s1 = inlined_call_operand.hbm [shape: f32[16,128], index: 1, kind: input, shape index: {}]   ;;  %s910_s2 = inlined_call_operand.hbm [shape: f32[128,128], index: 2, kind: input, shape index: {}]   ;;  %s911_s3 = inlined_call_operand.vmem [shape: f32[1,128], index: 3, kind: input, shape index: {}]   ;;  %s912_s4 = inlined_call_operand.hbm [shape: f32[128,128], index: 4, kind: input, shape index: {}]   ;;  %s913_s5 = inlined_call_operand.vmem [shape: f32[1,128], index: 5, kind: input, shape index: {}]   ;;  %s914_s6 = inlined_call_operand.vmem [shape: f32[1,128], index: 6, kind: input, shape index: {}]   ;;  %s915_s7 = inlined_call_operand.vmem [shape: f32[1,128], index: 7, kind: input, shape index: {}]   ;;  %s916_s8 = inlined_call_operand.hbm [shape: f32[16,128], index: 8, kind: output, shape index: {}]  }
   0x1   :  { %14 = vsyncpa [#allocation6], 0 }
   0x2   :  { %15 = vsyncpa [#allocation9], 0 }
   0x3   :  { %16 = vsyncpa [#allocation4], 0  ;;  %s753_s27 = smov [#allocation5]   ;;  %s754_s29 = smov [#allocation2]  }
   0x4   :  { %s34_s28 = sshll.u32 %s753_s27, 4  ;;  %s22_s30 = sshll.u32 %s754_s29, 4  ;;  %s35_s28 = int_to_ptr.vmem [resolvable:$true] %s34_s28  ;;  %s805_s30 = int_to_ptr.vmem [resolvable:$true] %s22_s30 }
   0x5   :  { %s635_s11 = scalar_lea.hbm %s909_s1, 256 }
   0x6   :  { %p636_p0 = scmp.ne.s32.totalorder %s909_s1, %s635_s11  ;;  %p639_p1 = scmp.lt.u32.totalorder %s635_s11, %s909_s1 }
   0x8   :  { %p641_p2 = pnand %p639_p1, %p636_p0 }
   0xa   :  { %644 = shalt.err (!%p641_p2)
}
   0xb   :  { %s645_s16 = scalar_lea.vmem %s35_s28, 256  ;;  %p650_p4 = scmp.lt.s32.totalorder %s35_s28, %s35_s28 }
   0xc   :  { %p646_p3 = scmp.ne.s32.totalorder %s35_s28, %s645_s16  ;;  %p651_p5 = scmp.lt.s32.totalorder %s645_s16, %s645_s16 }
   0xe   :  { %p652_p6 = por %p651_p5, %p650_p4 }
  0x10   :  { %p653_p7 = pnand %p652_p6, %p646_p3 }
  0x12   :  { %656 = shalt.err (!%p653_p7)
}
  0x13   :  { %s755_s17 = smov 128   ;;  %s756_s18 = smov 8  }
  0x14   :  { %40 = dma.hbm_to_vmem [thread:$0]  %s909_s1, 256, %s35_s28, [#allocation6], %s755_s17, %s755_s17, %s756_s18  }
  0x15   :  { %s657_s23 = scalar_lea.hbm %s908_s0, 256 }
  0x16   :  { %p658_p8 = scmp.ne.s32.totalorder %s908_s0, %s657_s23  ;;  %p661_p9 = scmp.lt.u32.totalorder %s657_s23, %s908_s0 }
  0x18   :  { %p663_p10 = pnand %p661_p9, %p658_p8 }
  0x1a   :  { %666 = shalt.err (!%p663_p10)
}
  0x1b   :  { %s667_s29 = scalar_lea.vmem %s805_s30, 256  ;;  %p672_p12 = scmp.lt.s32.totalorder %s805_s30, %s805_s30 }
  0x1c   :  { %p668_p11 = scmp.ne.s32.totalorder %s805_s30, %s667_s29  ;;  %p673_p13 = scmp.lt.s32.totalorder %s667_s29, %s667_s29 }
  0x1e   :  { %p674_p0 = por %p673_p13, %p672_p12 }
  0x20   :  { %p675_p1 = pnand %p674_p0, %p668_p11 }
  0x22   :  { %678 = shalt.err (!%p675_p1)
}
  0x23   :  { %28 = dma.hbm_to_vmem [thread:$0]  %s908_s0, 256, %s805_s30, [#allocation3], %s755_s17, %s755_s17, %s756_s18  }
  0x24   :  { %s757_s9 = smov [#allocation7]   ;;  %s758_s11 = smov [#allocation8]  }
  0x25   :  { %s46_s10 = sshll.u32 %s757_s9, 4  ;;  %s60_s12 = sshll.u32 %s758_s11, 4  ;;  %s47_s10 = int_to_ptr.vmem [resolvable:$true] %s46_s10  ;;  %s842_s12 = int_to_ptr.vmem [resolvable:$true] %s60_s12 }
  0x26   :  { %s679_s15 = scalar_lea.hbm %s910_s2, 2048 }
  0x27   :  { %p680_p2 = scmp.ne.s32.totalorder %s910_s2, %s679_s15  ;;  %p683_p3 = scmp.lt.u32.totalorder %s679_s15, %s910_s2 }
  0x29   :  { %p685_p4 = pnand %p683_p3, %p680_p2 }
  0x2b   :  { %688 = shalt.err (!%p685_p4)
}
  0x2c   :  { %s689_s0 = scalar_lea.vmem %s47_s10, 2048  ;;  %p694_p6 = scmp.lt.s32.totalorder %s47_s10, %s47_s10 }
  0x2d   :  { %p690_p5 = scmp.ne.s32.totalorder %s47_s10, %s689_s0  ;;  %p695_p7 = scmp.lt.s32.totalorder %s689_s0, %s689_s0 }
  0x2f   :  { %p696_p8 = por %p695_p7, %p694_p6 }
  0x31   :  { %p697_p9 = pnand %p696_p8, %p690_p5 }
  0x33   :  { %700 = shalt.err (!%p697_p9)
}
  0x34   :  { %52 = dma.hbm_to_vmem [thread:$0]  %s910_s2, 2048, %s47_s10, [#allocation6], %s755_s17, %s755_s17, %s756_s18  }
  0x35   :  { %s701_s25 = scalar_lea.hbm %s912_s4, 2048 }
  0x36   :  { %p702_p10 = scmp.ne.s32.totalorder %s912_s4, %s701_s25  ;;  %p705_p11 = scmp.lt.u32.totalorder %s701_s25, %s912_s4 }
  0x38   :  { %p707_p12 = pnand %p705_p11, %p702_p10 }
  0x3a   :  { %710 = shalt.err (!%p707_p12)
}
  0x3b   :  { %s711_s28 = scalar_lea.vmem %s842_s12, 2048  ;;  %p716_p0 = scmp.lt.s32.totalorder %s842_s12, %s842_s12 }
  0x3c   :  { %p712_p13 = scmp.ne.s32.totalorder %s842_s12, %s711_s28  ;;  %p717_p1 = scmp.lt.s32.totalorder %s711_s28, %s711_s28 }
  0x3e   :  { %p718_p2 = por %p717_p1, %p716_p0 }
  0x40   :  { %p719_p3 = pnand %p718_p2, %p712_p13 }
  0x42   :  { %722 = shalt.err (!%p719_p3)
}
  0x43   :  { %66 = dma.hbm_to_vmem [thread:$0]  %s912_s4, 2048, %s842_s12, [#allocation9], %s755_s17, %s755_s17, %s756_s18  }
  0x44   :  { %745 = dma.done.wait [#allocation3], 256  }
  0x45   :  { %746 = vsyncadd [#allocation3], 4294967040 }
  0x46   :  { %747 = dma.done.wait [#allocation6], 2304  }
  0x47   :  { %748 = vsyncadd [#allocation6], 4294964992 }
  0x48   :  { %749 = dma.done.wait [#allocation9], 2048  }
  0x49   :  { %750 = vsyncadd [#allocation9], 4294965248  ;;  %vm89_vm0 = vcmask 130048   ;;  %v87_v0 = vld [vmem:[#allocation5] sm:$0xff]  ;;  %v88_v1 = vld [vmem:[#allocation5 + $0x8] sm:$0xff]  ;;  %s759_s15 = smov [#allocation10]  }
  0x4a   :  { %v85_v2 = vld [vmem:[#allocation2] sm:$0xff]  ;;  %v558_v3 = vpack.c.bf16 %v88_v1, %v87_v0  ;;  %v172_v5 = vld [vmem:[#allocation7 + $0x8] sm:$0xff]  ;;  %v173_v7 = vld [vmem:[#allocation7 + $0x10] sm:$0xff]  ;;  %s421_s16 = sshll.u32 %s759_s15, 4  ;;  %s422_s16 = int_to_ptr.vmem [resolvable:$true] %s421_s16 }
  0x4b   :  { %485 = vmatprep.mubr.msk.f32.mxu0 %vm89_vm0, %v85_v2  ;;  %v171_v4 = vld [vmem:[#allocation7] sm:$0xff]  ;;  %v174_v8 = vld [vmem:[#allocation7 + $0x18] sm:$0xff]  ;;  %v176_v11 = vld [vmem:[#allocation7 + $0x28] sm:$0xff]  ;;  %s723_s19 = scalar_lea.vmem %s422_s16, 256  ;;  %p728_p5 = scmp.lt.s32.totalorder %s422_s16, %s422_s16 }
  0x4c   :  { %v562_v6 = vpack.c.bf16 %v172_v5, %v171_v4  ;;  %559 = vmatprep.subr.bf16.mxu0 %v558_v3  ;;  %v566_v9 = vpack.c.bf16 %v174_v8, %v173_v7  ;;  %v175_v10 = vld [vmem:[#allocation7 + $0x20] sm:$0xff]  ;;  %v86_v12 = vld [vmem:[#allocation2 + $0x8] sm:$0xff]  ;;  %v177_v14 = vld [vmem:[#allocation7 + $0x30] sm:$0xff]  ;;  %p724_p4 = scmp.ne.s32.totalorder %s422_s16, %s723_s19  ;;  %p729_p6 = scmp.lt.s32.totalorder %s723_s19, %s723_s19 }
  0x4d   :  { %561 = vmatpush3.bf16.msra.mxu0 %v558_v3  ;;  %v570_v13 = vpack.c.bf16 %v176_v11, %v175_v10  ;;  %v178_v15 = vld [vmem:[#allocation7 + $0x38] sm:$0xff]  ;;  %v179_v17 = vld [vmem:[#allocation7 + $0x40] sm:$0xff]  ;;  %v180_v18 = vld [vmem:[#allocation7 + $0x48] sm:$0xff] }
  0x4e   :  { %563 = vmatprep.subr.bf16.mxu1 %v562_v6  ;;  %v574_v16 = vpack.c.bf16 %v178_v15, %v177_v14  ;;  %v578_v19 = vpack.c.bf16 %v180_v18, %v179_v17  ;;  %v181_v20 = vld [vmem:[#allocation7 + $0x50] sm:$0xff]  ;;  %v182_v21 = vld [vmem:[#allocation7 + $0x58] sm:$0xff]  ;;  %v183_v23 = vld [vmem:[#allocation7 + $0x60] sm:$0xff]  ;;  %p730_p7 = por %p729_p6, %p728_p5 }
  0x4f   :  { %565 = vmatpush3.bf16.msra.mxu1 %v562_v6  ;;  %v582_v22 = vpack.c.bf16 %v182_v21, %v181_v20  ;;  %v184_v24 = vld [vmem:[#allocation7 + $0x68] sm:$0xff]  ;;  %v185_v26 = vld [vmem:[#allocation7 + $0x70] sm:$0xff]  ;;  %v186_v27 = vld [vmem:[#allocation7 + $0x78] sm:$0xff] }
  0x50   :  { %567 = vmatprep.subr.bf16.mxu1 %v566_v9  ;;  %486 = vmatmul.mubr.msk.f32.vlgmr.msra.gmra.mrb[0].mxu0 %vm89_vm0, %v86_v12  ;;  %v586_v25 = vpack.c.bf16 %v184_v24, %v183_v23  ;;  %v590_v28 = vpack.c.bf16 %v186_v27, %v185_v26  ;;  %v271_v29 = vld [vmem:[#allocation8] sm:$0xff]  ;;  %v272_v30 = vld [vmem:[#allocation8 + $0x8] sm:$0xff]  ;;  %v273_v31 = vld [vmem:[#allocation8 + $0x10] sm:$0xff]  ;;  %p731_p8 = pnand %p730_p7, %p724_p4 }
  0x51   :  { %v594_v32 = vpack.c.bf16 %v272_v30, %v271_v29  ;;  %v274_v33 = vld [vmem:[#allocation8 + $0x18] sm:$0xff]  ;;  %v275_v35 = vld [vmem:[#allocation8 + $0x20] sm:$0xff]  ;;  %v276_v36 = vld [vmem:[#allocation8 + $0x28] sm:$0xff] }
  0x52   :  { %v598_v34 = vpack.c.bf16 %v274_v33, %v273_v31  ;;  %v602_v37 = vpack.c.bf16 %v276_v36, %v275_v35  ;;  %v277_v38 = vld [vmem:[#allocation8 + $0x30] sm:$0xff]  ;;  %v278_v39 = vld [vmem:[#allocation8 + $0x38] sm:$0xff]  ;;  %v279_v41 = vld [vmem:[#allocation8 + $0x40] sm:$0xff] }
  0x53   :  { %569 = vmatpush3.bf16.msra.mxu1 %v566_v9  ;;  %595 = vmatprep.subr.bf16.mxu0 %v594_v32  ;;  %v606_v40 = vpack.c.bf16 %v278_v39, %v277_v38  ;;  %v280_v42 = vld [vmem:[#allocation8 + $0x48] sm:$0xff]  ;;  %v281_v44 = vld [vmem:[#allocation8 + $0x50] sm:$0xff]  ;;  %v282_v45 = vld [vmem:[#allocation8 + $0x58] sm:$0xff] }
  0x54   :  { %571 = vmatprep.subr.bf16.mxu1 %v570_v13  ;;  %597 = vmatpush3.bf16.msra.mxu0 %v594_v32  ;;  %v610_v43 = vpack.c.bf16 %v280_v42, %v279_v41  ;;  %v614_v46 = vpack.c.bf16 %v282_v45, %v281_v44  ;;  %v283_v47 = vld [vmem:[#allocation8 + $0x60] sm:$0xff]  ;;  %v284_v48 = vld [vmem:[#allocation8 + $0x68] sm:$0xff]  ;;  %v285_v52 = vld [vmem:[#allocation8 + $0x70] sm:$0xff] }
  0x55   :  { %599 = vmatprep.subr.bf16.mxu0 %v598_v34  ;;  %v618_v49 = vpack.c.bf16 %v284_v48, %v283_v47  ;;  %v286_v53 = vld [vmem:[#allocation8 + $0x78] sm:$0xff]  ;;  %v437_v55 = vld [vmem:[%s911_s3] ss:$0 sm:$0xff] }
  0x56   :  { %v622_v54 = vpack.c.bf16 %v286_v53, %v285_v52  ;;  %v438_v62 = vld [vmem:[%s913_s5] ss:$0 sm:$0xff] }
  0x57   :  { %573 = vmatpush3.bf16.msra.mxu1 %v570_v13  ;;  %v439_v27 = vld [vmem:[%s914_s6] ss:$0 sm:$0xff] }
  0x58   :  { %575 = vmatprep.subr.bf16.mxu1 %v574_v16  ;;  %601 = vmatpush3.bf16.msra.mxu0 %v598_v34  ;;  %v440_v30 = vld [vmem:[%s915_s7] ss:$0 sm:$0xff] }
  0x59   :  { %603 = vmatprep.subr.bf16.mxu0 %v602_v37 }
  0x5b   :  { %577 = vmatpush3.bf16.msra.mxu1 %v574_v16 }
  0x5c   :  { %579 = vmatprep.subr.bf16.mxu1 %v578_v19  ;;  %605 = vmatpush3.bf16.msra.mxu0 %v602_v37 }
  0x5d   :  { %607 = vmatprep.subr.bf16.mxu0 %v606_v40 }
  0x5f   :  { %581 = vmatpush3.bf16.msra.mxu1 %v578_v19 }
  0x60   :  { %583 = vmatprep.subr.bf16.mxu1 %v582_v22  ;;  %609 = vmatpush3.bf16.msra.mxu0 %v606_v40 }
  0x61   :  { %611 = vmatprep.subr.bf16.mxu0 %v610_v43 }
  0x63   :  { %585 = vmatpush3.bf16.msra.mxu1 %v582_v22 }
  0x64   :  { %587 = vmatprep.subr.bf16.mxu1 %v586_v25  ;;  %613 = vmatpush3.bf16.msra.mxu0 %v610_v43 }
  0x65   :  { %615 = vmatprep.subr.bf16.mxu0 %v614_v46 }
  0x67   :  { %589 = vmatpush3.bf16.msra.mxu1 %v586_v25 }
  0x68   :  { %591 = vmatprep.subr.bf16.mxu1 %v590_v28  ;;  %617 = vmatpush3.bf16.msra.mxu0 %v614_v46 }
  0x69   :  { %619 = vmatprep.subr.bf16.mxu0 %v618_v49 }
  0x6b   :  { %593 = vmatpush3.bf16.msra.mxu1 %v590_v28 }
  0x6c   :  { %621 = vmatpush3.bf16.msra.mxu0 %v618_v49 }
  0x6d   :  { %623 = vmatprep.subr.bf16.mxu0 %v622_v54 }
  0x70   :  { %625 = vmatpush3.bf16.msra.mxu0 %v622_v54 }
 0x123   :  { %v487_v50 = vpop.f32.mrb[0].mxu0 }
 0x124   :  { %v162_v51 = vpop.f32.mrb[1].mxu0 }
 0x125   :  { %520 = vmatprep.mubr.f32.mxu1 %v162_v51 }
 0x126   :  { %521 = vmatmul.mubr.f32.vlgmr.msra.gmra.mrb[0].mxu1 %v487_v50 }
 0x1f9   :  { %v522_v56 = vpop.f32.mrb[0].mxu1 }
 0x1fa   :  { %v266_v57 = vadd.f32 %v522_v56, %v437_v55  ;;  %v260_v58 = vpop.f32.mrb[1].mxu1 }
 0x1fb   :  { %v261_v59 = vadd.f32 %v437_v55, %v260_v58 }
 0x1fc   :  { %v270_v61 = vmax.f32 %v266_v57, 0.0 }
 0x1fd   :  { %v269_v60 = vmax.f32 %v261_v59, 0.0 }
 0x1ff   :  { %555 = vmatprep.mubr.f32.mxu0 %v269_v60 }
 0x200   :  { %556 = vmatmul.mubr.f32.vlgmr.msra.gmra.mrb[2].mxu0 %v270_v61 }
 0x2d3   :  { %v557_v63 = vpop.f32.mrb[2].mxu0 }
 0x2d4   :  { %v366_v0 = vadd.f32 %v557_v63, %v438_v62  ;;  %v360_v1 = vpop.f32.mrb[3].mxu0 }
 0x2d5   :  { %v361_v2 = vadd.f32 %v438_v62, %v360_v1 }
 0x2d6   :  { %v370_v3 = vmax.f32 %v366_v0, 0.0 }
 0x2d7   :  { %v369_v4 = vmax.f32 %v361_v2, 0.0 }
 0x2d9   :  { %v371_v5 = vadd.f32 %v370_v3, %v369_v4 }
 0x2db   :  { %v372_v6 = vrot.slane %v371_v5, 4 }
 0x2dd   :  { %v373_v7 = vadd.f32 %v372_v6, %v371_v5 }
 0x2df   :  { %v374_v8 = vrot.slane %v373_v7, 2 }
 0x2e1   :  { %v375_v9 = vadd.f32 %v374_v8, %v373_v7 }
 0x2e3   :  { %v376_v10 = vrot.slane %v375_v9, 1 }
 0x2e5   :  { %v377_v11 = vadd.f32 %v376_v10, %v375_v9 }
 0x2e7   :  { %v379_v12 = vmul.f32 0.0625, %v377_v11 }
 0x2e9   :  { %v380_v13 = vsub.f32 %v369_v4, %v379_v12  ;;  %v381_v14 = vsub.f32 %v370_v3, %v379_v12 }
 0x2eb   :  { %v382_v15 = vmul.f32 %v380_v13, %v380_v13  ;;  %v383_v16 = vmul.f32 %v381_v14, %v381_v14 }
 0x2ed   :  { %v384_v17 = vadd.f32 %v383_v16, %v382_v15 }
 0x2ef   :  { %v385_v18 = vrot.slane %v384_v17, 4 }
 0x2f1   :  { %v386_v19 = vadd.f32 %v385_v18, %v384_v17 }
 0x2f3   :  { %v387_v20 = vrot.slane %v386_v19, 2 }
 0x2f5   :  { %v388_v21 = vadd.f32 %v387_v20, %v386_v19 }
 0x2f7   :  { %v389_v22 = vrot.slane %v388_v21, 1 }
 0x2f9   :  { %v390_v23 = vadd.f32 %v389_v22, %v388_v21 }
 0x2fb   :  { %v391_v24 = vmul.f32 0.0625, %v390_v23 }
 0x2fd   :  { %v392_v25 = vadd.f32 1e-05, %v391_v24 }
 0x2ff   :  { %633 = vrsqrt.f32 %v392_v25 }
 0x309   :  { %v634_v26 = vpop.eup %633 }
 0x30a   :  { %v394_v28 = vmul.f32 %v634_v26, %v380_v13  ;;  %v395_v29 = vmul.f32 %v634_v26, %v381_v14 }
 0x30c   :  { %v403_v31 = vmul.f32 %v439_v27, %v394_v28  ;;  %v404_v32 = vmul.f32 %v439_v27, %v395_v29 }
 0x30e   :  { %v412_v33 = vadd.f32 %v440_v30, %v403_v31  ;;  %v413_v34 = vadd.f32 %v440_v30, %v404_v32 }
 0x310   :  { %414 = vst [vmem:[#allocation10] sm:$0xff] %v412_v33  ;;  %415 = vst [vmem:[#allocation10 + $0x8] sm:$0xff] %v413_v34 }
 0x311   :  { %734 = shalt.err (!%p731_p8)
}
 0x312   :  { %s735_s7 = scalar_lea.hbm %s916_s8, 256 }
 0x313   :  { %p736_p9 = scmp.ne.s32.totalorder %s916_s8, %s735_s7  ;;  %p739_p10 = scmp.lt.u32.totalorder %s735_s7, %s916_s8 }
 0x315   :  { %p741_p11 = pnand %p739_p10, %p736_p9 }
 0x317   :  { %744 = shalt.err (!%p741_p11)
}
 0x318   :  { %427 = dma.vmem_to_hbm [thread:$0]  %s422_s16, 256, %s916_s8, [#allocation4], %s755_s17, %s755_s17, %s756_s18  }
 0x319   :  { %751 = dma.done.wait [#allocation4], 256  }
 0x31a   :  { %752 = vsyncadd [#allocation4], 4294967040 }
 0x31b   :  { %431 = vsyncpa [#allocation3], 1 }
 0x31c   :  { %432 = vsyncpa [#allocation6], 1 }
 0x31d   :  { %433 = vsyncpa [#allocation9], 1 }
 0x31e   :  { %434 = vsyncpa [#allocation4], 1 }

</bundles_post_ra>
